<compile_context>
chip_gen: v7x
topology: tpu7x:2x2x1
jax: 0.10.0
libtpu: 0.0.40
codegen_flags: <defaults>
</compile_context>

<pallas_src>
import functools

import jax
import jax.numpy as jnp
from jax.experimental import pallas as pl
from jax.experimental.pallas import tpu as pltpu

NEG_INF = -1e9          # exp(NEG_INF - m) underflows to exactly 0 in f32
LEAKY_SLOPE = 0.2
LANE = 128
SUBLANE = 8


def _round_up(v, m):
    return (v + m - 1) // m * m


def _leaky_relu(x):
    # slope in (0, 1)  =>  leaky_relu(x) == max(x, slope * x): 1 mul + 1 max.
    return jnp.maximum(x, LEAKY_SLOPE * x)


def _elu(x):
    return jnp.where(x >= 0, x, jnp.exp(x) - 1.0)


def _maybe_vmem_limit(bytes_needed):
    """Explicit scoped-VMEM limit only when the default could be too small."""
    need = int(bytes_needed * 1.25) + (2 << 20)
    if need <= (12 << 20):       # fits even v5e's 16 MiB default -> leave unset
        return None
    return min(need, 128 << 20)


# ---------------------------------------------------------------------------
# Kernel 1: row-tiled projection prologue (O(N*F), not O(N^2)).
#   h      = feat @ W                       -> [tm, fout_p]  (mxu_dtype)
#   scores = h @ [a_l | a_r]                -> [tm, 2]       (f32)
#   h[:, ones_col] = 1  (spare padded column -> MXU-derived softmax denom)
# ---------------------------------------------------------------------------
def gat_project_kernel(feat_ref, w_ref, acat_ref, h_ref, scores_ref, *,
                       mxu_dtype, ones_col):
    feat = feat_ref[...].astype(mxu_dtype)
    w = w_ref[...].astype(mxu_dtype)
    h = jnp.dot(feat, w, preferred_element_type=jnp.float32)            # [tm, fout_p] f32
    scores_ref[...] = jnp.dot(h.astype(mxu_dtype), acat_ref[...].astype(mxu_dtype),
                              preferred_element_type=jnp.float32)        # [tm, 2] f32
    if ones_col is not None:
        # Plant a column of ones in the zero-padding region of h; rows >= real
        # feature count of W / [a_l a_r] in the next layer are zero, so this
        # never leaks into downstream math.
        col = jax.lax.broadcasted_iota(jnp.int32, h.shape, dimension=1)
        h = jnp.where(col == ones_col, 1.0, h)
    h_ref[...] = h.astype(h_ref.dtype)


# ---------------------------------------------------------------------------
# Kernel 2: row-tiled attention + aggregation (grid over row tiles).
#   e     = leaky_relu(el_tile + er_row), masked by adjacency        [tm, Np]
#   p     = exp(e - rowmax(e))                                        (f32)
#   agg   = p @ h        (denominator arrives for free in ones_col)   (MXU)
#   out   = (ELU?)(agg * reciprocal(denom))   -- deferred normalization
# ---------------------------------------------------------------------------
def gat_attn_kernel(el_ref, er_ref, adj_ref, h_ref, out_ref, *,
                    apply_elu, mxu_dtype, approx_recip, ones_col):
    e = _leaky_relu(el_ref[...] + er_ref[...])           # [tm,1] + [1,Np] -> [tm,Np] f32
    mask = adj_ref[...].astype(jnp.float32) > 0.0        # int8 {0,1} tile
    e = jnp.where(mask, e, NEG_INF)
    m = jnp.max(e, axis=-1, keepdims=True)
    p_f32 = jnp.exp(e - m)      # masked entries: exp(NEG_INF - m) == 0 exactly
    p = p_f32.astype(mxu_dtype)
    agg = jnp.dot(p, h_ref[...], preferred_element_type=jnp.float32)     # [tm, fout_p] f32
    if ones_col is not None:
        denom = agg[:, ones_col:ones_col + 1]            # MXU-derived row sum of p
    else:
        denom = jnp.sum(p_f32, axis=-1, keepdims=True)
    out = agg * pl.reciprocal(denom, approx=approx_recip)
    if apply_elu:
        out = _elu(out)
    out_ref[...] = out.astype(out_ref.dtype)


def gat_net_forward(x, adj, w1, al1, ar1, w2, al2, ar2, *,
                    mxu_dtype=jnp.bfloat16, tile_rows=128):
    N, F = x.shape
    H = w1.shape[1]
    C = w2.shape[1]
    f32 = jnp.float32
    mxu_bytes = jnp.dtype(mxu_dtype).itemsize
    approx_recip = jnp.dtype(mxu_dtype) != jnp.dtype(jnp.float32)

    # Padded sizes: feature dims lane-dense (x128), node dim to a whole tile.
    Fp, Hp, Cp = _round_up(F, LANE), _round_up(H, LANE), _round_up(C, LANE)
    Np = _round_up(N, SUBLANE)
    tm = min(tile_rows, Np)
    Np = _round_up(Np, tm)
    num_tiles = Np // tm

    # ---- pad / cast once in the wrapper (mxu_dtype -> halves prologue HBM) --
    xp = jnp.pad(x.astype(mxu_dtype), ((0, Np - N), (0, Fp - F)))
    w1p = jnp.pad(w1.astype(mxu_dtype), ((0, Fp - F), (0, Hp - H)))
    w2p = jnp.pad(w2.astype(mxu_dtype), ((0, Hp - H), (0, Cp - C)))
    a1p = jnp.pad(jnp.concatenate([al1, ar1], axis=1).astype(f32), ((0, Hp - H), (0, 0)))
    a2p = jnp.pad(jnp.concatenate([al2, ar2], axis=1).astype(f32), ((0, Cp - C), (0, 0)))

    # int8 adjacency mask, built directly in the narrow dtype (no f32 [Np,Np]
    # pass).  Self-loops enforced on EVERY row (real + padded) so each softmax
    # row has at least one unmasked entry.  NOTE: if adj is reused across
    # forward calls, hoist this preprocessing out of the hot path.
    adj_mask = jnp.pad((adj > 0).astype(jnp.int8), ((0, Np - N), (0, Np - N)))
    diag = jnp.arange(Np)
    adj_mask = adj_mask.at[diag, diag].set(jnp.int8(1))

    vmem_resident = pl.BlockSpec(memory_space=pltpu.MemorySpace.VMEM)

    def layer(feat, w, acat, fout, fout_p, out_dtype, apply_elu):
        fin_p = feat.shape[1]
        feat_bytes = jnp.dtype(feat.dtype).itemsize
        out_bytes = jnp.dtype(out_dtype).itemsize
        ones_col = fout if fout < fout_p else None   # spare zero-padded column?

        # -------- row-tiled projection prologue -----------------------------
        proj_vmem = (fin_p * fout_p * mxu_bytes          # resident W
                     + fout_p * LANE * 4                 # resident [a_l|a_r] (lane padded)
                     + 2 * tm * fin_p * feat_bytes       # feat tiles (double buffered)
                     + 2 * tm * fout_p * mxu_bytes       # h tiles
                     + 2 * tm * LANE * 4)                # scores tiles (lane padded)
        h, scores = pl.pallas_call(
            functools.partial(gat_project_kernel, mxu_dtype=mxu_dtype,
                              ones_col=ones_col),
            out_shape=(jax.ShapeDtypeStruct((Np, fout_p), mxu_dtype),
                       jax.ShapeDtypeStruct((Np, 2), f32)),
            grid_spec=pltpu.PrefetchScalarGridSpec(
                num_scalar_prefetch=0,
                grid=(num_tiles,),
                in_specs=[
                    pl.BlockSpec((tm, fin_p), lambda i: (i, 0)),   # feat rows (pipelined)
                    vmem_resident,                                 # W (resident)
                    vmem_resident,                                 # [a_l|a_r] (resident)
                ],
                out_specs=(pl.BlockSpec((tm, fout_p), lambda i: (i, 0)),
                           pl.BlockSpec((tm, 2), lambda i: (i, 0))),
            ),
            compiler_params=pltpu.CompilerParams(
                dimension_semantics=("parallel",),
                vmem_limit_bytes=_maybe_vmem_limit(proj_vmem)),
        )(feat, w, acat)

        # Layout plumbing once per layer (outside the hot tiled kernel):
        el = scores[:, 0:1]            # [Np, 1]
        er_row = scores[:, 1:2].T      # [1, Np] lane-major; no per-tile XLU transpose

        # -------- row-tiled attention + aggregation -------------------------
        attn_vmem = (2 * tm * Np * 1                     # int8 adj tiles (double buffered)
                     + Np * fout_p * mxu_bytes           # resident h (single buffer)
                     + SUBLANE * Np * 4                  # resident er row (sublane padded)
                     + 2 * tm * LANE * 4                 # el tiles (lane padded)
                     + 2 * tm * fout_p * out_bytes)      # out tiles (double buffered)
        cost = pl.CostEstimate(
            flops=2 * Np * Np * fout_p + 8 * Np * Np,
            transcendentals=Np * Np + Np,
            bytes_accessed=Np * Np + Np * fout_p * (mxu_bytes + out_bytes) + 12 * Np)

        out = pl.pallas_call(
            functools.partial(gat_attn_kernel, apply_elu=apply_elu,
                              mxu_dtype=mxu_dtype, approx_recip=approx_recip,
                              ones_col=ones_col),
            out_shape=jax.ShapeDtypeStruct((Np, fout_p), out_dtype),
            grid_spec=pltpu.PrefetchScalarGridSpec(
                num_scalar_prefetch=0,
                grid=(num_tiles,),
                in_specs=[
                    pl.BlockSpec((tm, 1), lambda i: (i, 0)),   # el rows (tiny pipelined tile)
                    vmem_resident,                             # er row [1, Np] (resident)
                    pl.BlockSpec((tm, Np), lambda i: (i, 0)),  # int8 adj tile (pipelined DMA)
                    vmem_resident,                             # full h (resident, single buffer)
                ],
                out_specs=pl.BlockSpec((tm, fout_p), lambda i: (i, 0)),
            ),
            compiler_params=pltpu.CompilerParams(
                dimension_semantics=("parallel",),   # row tiles shard across TensorCores
                vmem_limit_bytes=_maybe_vmem_limit(attn_vmem)),
            cost_estimate=cost,
        )(el, er_row, adj_mask, h)
        return out

    h1 = layer(xp, w1p, a1p, H, Hp, mxu_dtype, apply_elu=True)   # GAT layer 1 (+ELU), bf16 round-trip
    logits = layer(h1, w2p, a2p, C, Cp, f32, apply_elu=False)    # GAT layer 2 (raw logits, f32)
    return logits[:N, :C]


# ---------------------------------------------------------------------------
# Plain-JAX reference (forward semantics of NET.forward)
# ---------------------------------------------------------------------------
def _ref_forward(x, adj, w1, al1, ar1, w2, al2, ar2):
    def layer(feat, w, al, ar, act):
        h = feat @ w
        e = jnp.maximum(h @ al + (h @ ar).T, LEAKY_SLOPE * (h @ al + (h @ ar).T))
        e = jnp.where(adj > 0, e, NEG_INF)
        a = jax.nn.softmax(e, axis=-1)
        return act(a @ h)
    h1 = layer(x, w1, al1, ar1, _elu)
    return layer(h1, w2, al2, ar2, lambda z: z)


if __name__ == "__main__":
    # Small shapes consistent with a PPI GAT forward.
    N, F_IN, H, C = 16, 32, 32, 8

    key = jax.random.PRNGKey(0)
    k_x, k_adj, k_w1, k_a1, k_w2, k_a2 = jax.random.split(key, 6)

    x = jax.random.normal(k_x, (N, F_IN), dtype=jnp.float32)

    # Random sparse-ish adjacency WITH self-loops.
    adj_rand = (jax.random.uniform(k_adj, (N, N)) < 0.3).astype(jnp.float32)
    adj = jnp.maximum(adj_rand, jnp.eye(N, dtype=jnp.float32))

    def xavier(k, shape):
        scale = jnp.sqrt(2.0 / (shape[0] + shape[1]))
        return scale * jax.random.normal(k, shape, dtype=jnp.float32)

    w1 = xavier(k_w1, (F_IN, H))
    ka1l, ka1r = jax.random.split(k_a1)
    al1, ar1 = xavier(ka1l, (H, 1)), xavier(ka1r, (H, 1))

    w2 = xavier(k_w2, (H, C))
    ka2l, ka2r = jax.random.split(k_a2)
    al2, ar2 = xavier(ka2l, (C, 1)), xavier(ka2r, (C, 1))

    ref = _ref_forward(x, adj, w1, al1, ar1, w2, al2, ar2)

    # Accuracy path: f32 MXU operands + exact reciprocal -> tight check.
    out_f32 = jax.block_until_ready(
        gat_net_forward(x, adj, w1, al1, ar1, w2, al2, ar2,
                        mxu_dtype=jnp.float32))
    assert out_f32.shape == (N, C)
    assert jnp.allclose(out_f32, ref, atol=1e-4, rtol=1e-4), "f32 path mismatch vs reference"

    # Perf path (default): bf16 MXU operands + approx EUP reciprocal -> loose check.
    out_bf16 = jax.block_until_ready(
        gat_net_forward(x, adj, w1, al1, ar1, w2, al2, ar2))
    assert out_bf16.shape == (N, C)
    assert bool(jnp.all(jnp.isfinite(out_bf16)))
    assert float(jnp.max(jnp.abs(out_bf16 - ref))) < 0.5, "bf16 path drifted too far"

    print("KERNEL_OK")
</pallas_src>

<mosaic_0001>
module attributes {stable_mosaic.version = 11 : i64} {
  func.func @gat_project_kernel(%arg0: i32, %arg1: memref<16x128xf32, #tpu.memory_space<vmem>>, %arg2: memref<128x128xf32, #tpu.memory_space<vmem>>, %arg3: memref<128x2xf32, #tpu.memory_space<vmem>>, %arg4: memref<16x128xf32, #tpu.memory_space<vmem>>, %arg5: memref<16x2xf32, #tpu.memory_space<vmem>>) attributes {dimension_semantics = [#tpu.dimension_semantics<parallel>], iteration_bounds = array<i64: 1>, scalar_prefetch = 0 : i64, scratch_operands = 0 : i64, tpu.core_type = #tpu.core_type<tc>, window_params = [{transform_indices = @transform_0, window_bounds = array<i64: 16, 128>}, {pipeline_mode = #tpu.pipeline_mode<synchronous>, transform_indices = @transform_1, window_bounds = array<i64: 128, 128>}, {pipeline_mode = #tpu.pipeline_mode<synchronous>, transform_indices = @transform_2, window_bounds = array<i64: 128, 2>}, {transform_indices = @transform_3, window_bounds = array<i64: 16, 128>}, {transform_indices = @transform_4, window_bounds = array<i64: 16, 2>}]} {
    %c0 = arith.constant 0 : index
    %c0_0 = arith.constant 0 : index
    %0 = vector.load %arg1[%c0, %c0_0] : memref<16x128xf32, #tpu.memory_space<vmem>>, vector<16x128xf32>
    %c0_1 = arith.constant 0 : index
    %c0_2 = arith.constant 0 : index
    %1 = vector.load %arg2[%c0_1, %c0_2] : memref<128x128xf32, #tpu.memory_space<vmem>>, vector<128x128xf32>
    %cst = arith.constant dense<0.000000e+00> : vector<16x128xf32>
    %2 = tpu.matmul %0, %1, %cst {dimension_numbers = #tpu.dot_dimension_numbers<[1], [0], [0], [1], [0, 0, 1, 1], [], []>} : vector<16x128xf32>, vector<128x128xf32>, vector<16x128xf32> -> vector<16x128xf32>
    %c0_3 = arith.constant 0 : index
    %c0_4 = arith.constant 0 : index
    %3 = vector.load %arg3[%c0_3, %c0_4] : memref<128x2xf32, #tpu.memory_space<vmem>>, vector<128x2xf32>
    %cst_5 = arith.constant dense<0.000000e+00> : vector<16x2xf32>
    %4 = tpu.matmul %2, %3, %cst_5 {dimension_numbers = #tpu.dot_dimension_numbers<[1], [0], [0], [1], [0, 0, 1, 1], [], []>} : vector<16x128xf32>, vector<128x2xf32>, vector<16x2xf32> -> vector<16x2xf32>
    %c0_6 = arith.constant 0 : index
    %c0_7 = arith.constant 0 : index
    %5 = vector.load %arg5[%c0_6, %c0_7] : memref<16x2xf32, #tpu.memory_space<vmem>>, vector<16x2xf32>
    tpu.vector_store %arg5[%c0_6, %c0_7], %4 {strides = array<i32>} : memref<16x2xf32, #tpu.memory_space<vmem>>, vector<16x2xf32>,
    %6 = tpu.iota {dimensions = array<i32: 1>} : vector<16x128xi32>
    %c32_i32 = arith.constant 32 : i32
    %7 = vector.broadcast %c32_i32 : i32 to vector<16x128xi32>
    %8 = arith.cmpi eq, %6, %7 : vector<16x128xi32>
    %cst_8 = arith.constant 1.000000e+00 : f32
    %9 = vector.broadcast %cst_8 : f32 to vector<16x128xf32>
    %10 = arith.select %8, %9, %2 : vector<16x128xi1>, vector<16x128xf32>
    %c0_9 = arith.constant 0 : index
    %c0_10 = arith.constant 0 : index
    %11 = vector.load %arg4[%c0_9, %c0_10] : memref<16x128xf32, #tpu.memory_space<vmem>>, vector<16x128xf32>
    tpu.vector_store %arg4[%c0_9, %c0_10], %10 {strides = array<i32>} : memref<16x128xf32, #tpu.memory_space<vmem>>, vector<16x128xf32>,
    return
  }
  func.func @transform_0(%arg0: i32) -> (i32, i32) {
    %c0_i32 = arith.constant 0 : i32
    %c0_i32_0 = arith.constant 0 : i32
    return %arg0, %c0_i32 : i32, i32
  }
  func.func @transform_1(%arg0: i32) -> (i32, i32) {
    %c0_i32 = arith.constant 0 : i32
    %c0_i32_0 = arith.constant 0 : i32
    %c0_i32_1 = arith.constant 0 : i32
    return %c0_i32, %c0_i32_0 : i32, i32
  }
  func.func @transform_2(%arg0: i32) -> (i32, i32) {
    %c0_i32 = arith.constant 0 : i32
    %c0_i32_0 = arith.constant 0 : i32
    %c0_i32_1 = arith.constant 0 : i32
    return %c0_i32, %c0_i32_0 : i32, i32
  }
  func.func @transform_3(%arg0: i32) -> (i32, i32) {
    %c0_i32 = arith.constant 0 : i32
    %c0_i32_0 = arith.constant 0 : i32
    return %arg0, %c0_i32 : i32, i32
  }
  func.func @transform_4(%arg0: i32) -> (i32, i32) {
    %c0_i32 = arith.constant 0 : i32
    %c0_i32_0 = arith.constant 0 : i32
    return %arg0, %c0_i32 : i32, i32
  }
}

</mosaic_0001>

<bundles_post_ra>
// kernel: tpu_custom_call.1
= control target key start
LH: loop header
LB: loop body
LE: loop exit
PB: predicated region body
PF: predicated region fallthrough
CT: control target
= control target key end

     0   :  { %10 = vsyncpa [#allocation3], 0  ;;  %s629_s0 = inlined_call_operand.hbm [shape: f32[16,128], index: 0, kind: input, shape index: {}]   ;;  %s630_s1 = inlined_call_operand.vmem [shape: f32[128,128], index: 1, kind: input, shape index: {}]   ;;  %s631_s2 = inlined_call_operand.vmem [shape: f32[128,2], index: 2, kind: input, shape index: {}]   ;;  %s632_s3 = inlined_call_operand.hbm [shape: f32[16,128], index: 3, kind: output, shape index: {0}]   ;;  %s633_s4 = inlined_call_operand.vmem [shape: f32[16,2], index: 4, kind: output, shape index: {1}]  }
   0x1   :  { %11 = vsyncpa [#allocation4], 0  ;;  %s468_s15 = smov [#allocation2]   ;;  %s420_s19 = scalar_lea.hbm %s629_s0, 256 }
   0x2   :  { %s17_s16 = sshll.u32 %s468_s15, 4  ;;  %p421_p0 = scmp.ne.s32.totalorder %s629_s0, %s420_s19  ;;  %s18_s16 = int_to_ptr.vmem [resolvable:$true] %s17_s16 }
   0x3   :  { %p424_p1 = scmp.lt.u32.totalorder %s420_s19, %s629_s0 }
   0x5   :  { %p426_p2 = pnand %p424_p1, %p421_p0 }
   0x7   :  { %429 = shalt.err (!%p426_p2)
}
   0x8   :  { %s430_s24 = scalar_lea.vmem %s18_s16, 256  ;;  %p435_p4 = scmp.lt.s32.totalorder %s18_s16, %s18_s16 }
   0x9   :  { %p431_p3 = scmp.ne.s32.totalorder %s18_s16, %s430_s24  ;;  %p436_p5 = scmp.lt.s32.totalorder %s430_s24, %s430_s24 }
   0xb   :  { %p437_p6 = por %p436_p5, %p435_p4 }
   0xd   :  { %p438_p7 = pnand %p437_p6, %p431_p3 }
   0xf   :  { %441 = shalt.err (!%p438_p7)
}
  0x10   :  { %s469_s25 = smov 128   ;;  %s470_s26 = smov 8  }
  0x11   :  { %23 = dma.hbm_to_vmem [thread:$0]  %s629_s0, 256, %s18_s16, [#allocation3], %s469_s25, %s469_s25, %s470_s26  }
  0x12   :  { %464 = dma.done.wait [#allocation3], 256  }
  0x13   :  { %465 = vsyncadd [#allocation3], 4294967040  ;;  %v33_v0 = vld [vmem:[%s630_s1] sm:$0xff]  ;;  %v34_v1 = vld [vmem:[%s630_s1 + $0x8] sm:$0xff]  ;;  %v218_v50 = vlaneseq }
  0x14   :  { %v35_v2 = vld [vmem:[%s630_s1 + $0x10] sm:$0xff]  ;;  %v352_v3 = vpack.c.bf16 %v34_v1, %v33_v0  ;;  %v36_v4 = vld [vmem:[%s630_s1 + $0x18] sm:$0xff]  ;;  %v37_v6 = vld [vmem:[%s630_s1 + $0x20] sm:$0xff] }
  0x15   :  { %v356_v5 = vpack.c.bf16 %v36_v4, %v35_v2  ;;  %v38_v7 = vld [vmem:[%s630_s1 + $0x28] sm:$0xff]  ;;  %v39_v9 = vld [vmem:[%s630_s1 + $0x30] sm:$0xff]  ;;  %v40_v10 = vld [vmem:[%s630_s1 + $0x38] sm:$0xff]  ;;  %v219_v51 = vand.u32 127, %v218_v50 }
  0x16   :  { %353 = vmatprep.subr.bf16.mxu0 %v352_v3  ;;  %v360_v8 = vpack.c.bf16 %v38_v7, %v37_v6  ;;  %v31_v11 = vld [vmem:[#allocation2] sm:$0xff]  ;;  %v125_v13 = vld [vmem:[%s631_s2 + $0x8] sm:$0xff]  ;;  %v126_v14 = vld [vmem:[%s631_s2 + $0x10] sm:$0xff]  ;;  %v364_v20 = vpack.c.bf16 %v40_v10, %v39_v9 }
  0x17   :  { %355 = vmatpush3.bf16.msra.mxu0 %v352_v3  ;;  %314 = vmatprep.mubr.f32.mxu0 %v31_v11  ;;  %v124_v12 = vld [vmem:[%s631_s2] sm:$0xff]  ;;  %v127_v16 = vld [vmem:[%s631_s2 + $0x18] sm:$0xff]  ;;  %v129_v19 = vld [vmem:[%s631_s2 + $0x28] sm:$0xff]  ;;  %vm220_vm0 = vcmp.eq.s32.totalorder %v219_v51, 32 }
  0x18   :  { %357 = vmatprep.subr.bf16.mxu0 %v356_v5  ;;  %v384_v15 = vpack.c.bf16 %v125_v13, %v124_v12  ;;  %v388_v17 = vpack.c.bf16 %v127_v16, %v126_v14  ;;  %v128_v18 = vld [vmem:[%s631_s2 + $0x20] sm:$0xff]  ;;  %v42_v22 = vld [vmem:[%s630_s1 + $0x48] sm:$0xff]  ;;  %v130_v24 = vld [vmem:[%s631_s2 + $0x30] sm:$0xff] }
  0x19   :  { %v41_v21 = vld [vmem:[%s630_s1 + $0x40] sm:$0xff]  ;;  %v392_v23 = vpack.c.bf16 %v129_v19, %v128_v18  ;;  %v131_v25 = vld [vmem:[%s631_s2 + $0x38] sm:$0xff]  ;;  %v43_v27 = vld [vmem:[%s630_s1 + $0x50] sm:$0xff] }
  0x1a   :  { %385 = vmatprep.subr.bf16.mxu1 %v384_v15  ;;  %v368_v26 = vpack.c.bf16 %v42_v22, %v41_v21  ;;  %v44_v28 = vld [vmem:[%s630_s1 + $0x58] sm:$0xff]  ;;  %v396_v29 = vpack.c.bf16 %v131_v25, %v130_v24  ;;  %v132_v30 = vld [vmem:[%s631_s2 + $0x40] sm:$0xff]  ;;  %v133_v31 = vld [vmem:[%s631_s2 + $0x48] sm:$0xff] }
  0x1b   :  { %359 = vmatpush3.bf16.msra.mxu0 %v356_v5  ;;  %387 = vmatpush3.bf16.msra.mxu1 %v384_v15  ;;  %v372_v32 = vpack.c.bf16 %v44_v28, %v43_v27  ;;  %v45_v33 = vld [vmem:[%s630_s1 + $0x60] sm:$0xff]  ;;  %v46_v34 = vld [vmem:[%s630_s1 + $0x68] sm:$0xff]  ;;  %v400_v35 = vpack.c.bf16 %v133_v31, %v132_v30  ;;  %v134_v36 = vld [vmem:[%s631_s2 + $0x50] sm:$0xff] }
  0x1c   :  { %361 = vmatprep.subr.bf16.mxu0 %v360_v8  ;;  %389 = vmatprep.subr.bf16.mxu1 %v388_v17  ;;  %v135_v37 = vld [vmem:[%s631_s2 + $0x58] sm:$0xff]  ;;  %v376_v38 = vpack.c.bf16 %v46_v34, %v45_v33  ;;  %v47_v39 = vld [vmem:[%s630_s1 + $0x70] sm:$0xff]  ;;  %v136_v42 = vld [vmem:[%s631_s2 + $0x60] sm:$0xff] }
  0x1d   :  { %v48_v40 = vld [vmem:[%s630_s1 + $0x78] sm:$0xff]  ;;  %v404_v41 = vpack.c.bf16 %v135_v37, %v134_v36  ;;  %v137_v43 = vld [vmem:[%s631_s2 + $0x68] sm:$0xff]  ;;  %v138_v46 = vld [vmem:[%s631_s2 + $0x70] sm:$0xff] }
  0x1e   :  { %v380_v44 = vpack.c.bf16 %v48_v40, %v47_v39  ;;  %v408_v45 = vpack.c.bf16 %v137_v43, %v136_v42  ;;  %v139_v47 = vld [vmem:[%s631_s2 + $0x78] sm:$0xff]  ;;  %v32_v49 = vld [vmem:[#allocation2 + $0x8] sm:$0xff]  ;;  %s471_s2 = smov [#allocation5]  }
  0x1f   :  { %363 = vmatpush3.bf16.msra.mxu0 %v360_v8  ;;  %391 = vmatpush3.bf16.msra.mxu1 %v388_v17  ;;  %v412_v48 = vpack.c.bf16 %v139_v47, %v138_v46  ;;  %s230_s15 = sshll.u32 %s471_s2, 4  ;;  %s231_s15 = int_to_ptr.vmem [resolvable:$true] %s230_s15 }
  0x20   :  { %365 = vmatprep.subr.bf16.mxu0 %v364_v20  ;;  %393 = vmatprep.subr.bf16.mxu1 %v392_v23  ;;  %s442_s16 = scalar_lea.vmem %s231_s15, 256  ;;  %p447_p9 = scmp.lt.s32.totalorder %s231_s15, %s231_s15 }
  0x21   :  { %p443_p8 = scmp.ne.s32.totalorder %s231_s15, %s442_s16  ;;  %p448_p10 = scmp.lt.s32.totalorder %s442_s16, %s442_s16 }
  0x23   :  { %367 = vmatpush3.bf16.msra.mxu0 %v364_v20  ;;  %395 = vmatpush3.bf16.msra.mxu1 %v392_v23  ;;  %p449_p11 = por %p448_p10, %p447_p9 }
  0x24   :  { %369 = vmatprep.subr.bf16.mxu0 %v368_v26  ;;  %397 = vmatprep.subr.bf16.mxu1 %v396_v29 }
  0x25   :  { %p450_p12 = pnand %p449_p11, %p443_p8 }
  0x27   :  { %371 = vmatpush3.bf16.msra.mxu0 %v368_v26  ;;  %399 = vmatpush3.bf16.msra.mxu1 %v396_v29 }
  0x28   :  { %373 = vmatprep.subr.bf16.mxu0 %v372_v32  ;;  %401 = vmatprep.subr.bf16.mxu1 %v400_v35 }
  0x2b   :  { %375 = vmatpush3.bf16.msra.mxu0 %v372_v32  ;;  %403 = vmatpush3.bf16.msra.mxu1 %v400_v35 }
  0x2c   :  { %377 = vmatprep.subr.bf16.mxu0 %v376_v38  ;;  %405 = vmatprep.subr.bf16.mxu1 %v404_v41 }
  0x2f   :  { %379 = vmatpush3.bf16.msra.mxu0 %v376_v38  ;;  %407 = vmatpush3.bf16.msra.mxu1 %v404_v41 }
  0x30   :  { %381 = vmatprep.subr.bf16.mxu0 %v380_v44  ;;  %409 = vmatprep.subr.bf16.mxu1 %v408_v45 }
  0x33   :  { %383 = vmatpush3.bf16.msra.mxu0 %v380_v44  ;;  %411 = vmatpush3.bf16.msra.mxu1 %v408_v45 }
  0x34   :  { %413 = vmatprep.subr.bf16.mxu1 %v412_v48 }
  0x36   :  { %315 = vmatmul.mubr.f32.vlgmr.msra.gmra.mrb[0].mxu0 %v32_v49 }
  0x37   :  { %415 = vmatpush3.bf16.msra.mxu1 %v412_v48 }
 0x109   :  { %v316_v52 = vpop.f32.mrb[0].mxu0 }
 0x10a   :  { %v115_v53 = vpop.f32.mrb[1].mxu0  ;;  %v222_v54 = vsel %vm220_vm0, 1.0, %v316_v52 }
 0x10b   :  { %v221_v55 = vsel %vm220_vm0, 1.0, %v115_v53  ;;  %224 = vst [vmem:[#allocation5 + $0x8] sm:$0xff] %v222_v54  ;;  %349 = vmatprep.mubr.f32.mxu1 %v115_v53 }
 0x10c   :  { %223 = vst [vmem:[#allocation5] sm:$0xff] %v221_v55  ;;  %350 = vmatmul.mubr.f32.vlgmr.msra.gmra.mrb[0].mxu1 %v316_v52 }
 0x10d   :  { %453 = shalt.err (!%p450_p12)
}
 0x10e   :  { %s454_s19 = scalar_lea.hbm %s632_s3, 256 }
 0x10f   :  { %p455_p13 = scmp.ne.s32.totalorder %s632_s3, %s454_s19  ;;  %p458_p0 = scmp.lt.u32.totalorder %s454_s19, %s632_s3 }
 0x111   :  { %p460_p1 = pnand %p458_p0, %p455_p13 }
 0x113   :  { %463 = shalt.err (!%p460_p1)
}
 0x114   :  { %236 = dma.vmem_to_hbm [thread:$0]  %s231_s15, 256, %s632_s3, [#allocation4], %s469_s25, %s469_s25, %s470_s26   ;;  %vm215_vm1 = vcmask 15360  }
 0x1df   :  { %v351_v56 = vpop.f32.mrb[0].mxu1 }
 0x1e0   :  { %217 = vst.msk [vmem:[%s633_s4 + $0x8] sm:$0xff] %vm215_vm1, %v351_v56  ;;  %v206_v57 = vpop.f32.mrb[1].mxu1 }
 0x1e1   :  { %216 = vst.msk [vmem:[%s633_s4] sm:$0xff] %vm215_vm1, %v206_v57 }
 0x1e2   :  { %466 = dma.done.wait [#allocation4], 256  }
 0x1e3   :  { %467 = vsyncadd [#allocation4], 4294967040 }
 0x1e4   :  { %244 = vsyncpa [#allocation3], 1 }
 0x1e5   :  { %245 = vsyncpa [#allocation4], 1 }

</bundles_post_ra>
